<compile_context>
chip_gen: v7x
topology: tpu7x:2x2x1
jax: 0.10.0
libtpu: 0.0.40
codegen_flags: <defaults>
</compile_context>

<pallas_src>
import functools
import math

import jax
import jax.numpy as jnp
from jax.experimental import pallas as pl
from jax.experimental.pallas import tpu as pltpu

_LANE = 128          # lane width (pad hidden/output feature dims to this)
_SUBLANE_BF16 = 16   # bf16 packs 16 rows per vreg; pad batch to this


def _round_up(x, m):
    return ((x + m - 1) // m) * m


def _make_fused_mlp_kernel(n_layers):
    """Fused MLP kernel for `n_layers` Linear+ReLU layers.

    Ref layout:
      refs[0]            : x_ref   bf16 [TB, Cin]            (native width)
      refs[1 + 2*l]      : w_ref_l bf16 [Dl_in(_pad), Dl_out_pad]  (pre-transposed)
      refs[2 + 2*l]      : b_ref_l f32  [1, Dl_out_pad]
      refs[-1]           : o_ref   f32  [TB, Dlast_out_pad]
    Intermediates stay in vregs/VMEM; nothing leaves the chip between layers.
    """
    def kernel(*refs):
        x_ref = refs[0]
        o_ref = refs[-1]
        wb = refs[1:-1]
        h = x_ref[...]                                    # bf16 [TB, Cin]
        for l in range(n_layers):
            w = wb[2 * l][...]                            # bf16 [Din, Dout_pad]
            b = wb[2 * l + 1][...]                        # f32  [1, Dout_pad]
            lhs = h if h.dtype == jnp.bfloat16 else h.astype(jnp.bfloat16)
            y = jnp.dot(lhs, w, preferred_element_type=jnp.float32)
            h = jnp.maximum(y + b, 0.0)                   # ReLU after every layer
        o_ref[...] = h
    return kernel


def init_body_net_params(key, in_channels, hidden_layers, out_channels):
    """PyTorch-equivalent init: weight [out, in] ~ Normal(std=0.15),
    bias ~ Uniform(-1/sqrt(fan_in), 1/sqrt(fan_in)) (nn.Linear default)."""
    layer_sizes = list(hidden_layers) + [out_channels]
    params = []
    fan_in = in_channels
    for fan_out in layer_sizes:
        key, kw, kb = jax.random.split(key, 3)
        w = 0.15 * jax.random.normal(kw, (fan_out, fan_in), dtype=jnp.float32)
        bound = 1.0 / math.sqrt(fan_in)
        b = jax.random.uniform(kb, (fan_out,), jnp.float32,
                               minval=-bound, maxval=bound)
        params.append((w, b))
        fan_in = fan_out
    return params


def pack_body_net_params(params):
    """One-time packing: transpose weights to [in, out], zero-pad output dims
    (and input dims of all but the FIRST layer) to multiples of 128 lanes,
    cast weights to bf16 (biases stay f32, shape [1, out_pad]).
    The first layer keeps its native input width so x needs no lane padding."""
    packed = []
    for idx, (w, b) in enumerate(params):
        dout, din = w.shape
        din_p = din if idx == 0 else _round_up(din, _LANE)
        dout_p = _round_up(dout, _LANE)
        w_t = jnp.zeros((din_p, dout_p), jnp.float32).at[:din, :dout].set(w.T)
        b_p = jnp.zeros((1, dout_p), jnp.float32).at[0, :dout].set(b)
        packed.append((w_t.astype(jnp.bfloat16), b_p))
    return packed


@functools.partial(jax.jit, static_argnames=("layer_dims", "batch_tile"))
def body_net_forward(x, packed_params, *, layer_dims, batch_tile=256):
    """layer_dims = (in_channels, hidden..., out_channels) — the REAL dims."""
    in_channels = layer_dims[0]
    out_channels = layer_dims[-1]

    # out = x.view(-1, in_channels).float(); cast to bf16 ONCE (matmul operand
    # dtype) so no per-step cast and half the input DMA bytes.
    x2 = x.reshape(-1, in_channels).astype(jnp.float32)
    xb = x2.astype(jnp.bfloat16)
    B = xb.shape[0]

    dout_p = packed_params[-1][0].shape[1]
    n_layers = len(packed_params)

    # Batch padding / tiling: multiple of 16 (bf16 sublanes). Big tiles
    # amortize the ~0.35us per-grid-step overhead; for moderate/large batches
    # make sure the "parallel" grid has >= 2 steps (v7x has 2 TensorCores).
    b_pad0 = _round_up(max(B, 1), _SUBLANE_BF16)
    tb = min(batch_tile, b_pad0)
    if b_pad0 >= 256:
        tb = min(tb, _round_up(pl.cdiv(b_pad0, 2), _SUBLANE_BF16))
    b_pad = _round_up(b_pad0, tb)

    if b_pad == B:
        x_p = xb
    else:
        x_p = jnp.zeros((b_pad, in_channels), jnp.bfloat16).at[:B].set(xb)

    kernel = _make_fused_mlp_kernel(n_layers)

    # Input: native feature width (block last dim == full array dim -> legal).
    in_specs = [pl.BlockSpec((tb, in_channels), lambda i: (i, 0))]
    flat_args = [x_p]
    # Weights / biases never change across the batch grid -> single-buffered.
    for w_t, b_p in packed_params:
        in_specs.append(pl.BlockSpec(w_t.shape, lambda i: (0, 0),
                                     pipeline_mode=pl.Buffered(1)))
        in_specs.append(pl.BlockSpec(b_p.shape, lambda i: (0, 0),
                                     pipeline_mode=pl.Buffered(1)))
        flat_args.extend([w_t, b_p])

    # Cost estimate from REAL (unpadded) dims.
    flops = 2 * B * sum(layer_dims[i] * layer_dims[i + 1]
                        for i in range(n_layers))
    bytes_accessed = (B * in_channels * 2 + B * out_channels * 4
                      + sum(layer_dims[i] * layer_dims[i + 1] * 2
                            + layer_dims[i + 1] * 4
                            for i in range(n_layers)))
    cost = pl.CostEstimate(flops=flops, transcendentals=0,
                           bytes_accessed=bytes_accessed)

    # Only raise the scoped-VMEM limit when the layer sizes actually need it.
    max_feat_p = max(int(w.shape[1]) for w, _ in packed_params)
    vmem_est = (2 * tb * in_channels * 2                 # x, double-buffered bf16
                + sum(int(w.size) * 2 + int(b.size) * 4  # weights/biases, 1 buffer
                      for w, b in packed_params)
                + 2 * tb * dout_p * 4                    # out, double-buffered f32
                + 4 * tb * max_feat_p * 4)               # live f32 activations
    vmem_limit = None
    if vmem_est > 12 * 1024 * 1024:
        vmem_limit = int(min(max(3 * vmem_est // 2, 16 * 1024 * 1024),
                             48 * 1024 * 1024))

    out_p = pl.pallas_call(
        kernel,
        out_shape=jax.ShapeDtypeStruct((b_pad, dout_p), jnp.float32),
        grid=(b_pad // tb,),
        in_specs=in_specs,
        out_specs=pl.BlockSpec((tb, dout_p), lambda i: (i, 0)),
        compiler_params=pltpu.CompilerParams(
            dimension_semantics=("parallel",),
            vmem_limit_bytes=vmem_limit),
        cost_estimate=cost,
    )(*flat_args)

    # Slice away batch/lane padding (glue, outside the kernel).
    return out_p[:B, :out_channels]


def body_net_reference(x, params, in_channels):
    """Pure-JAX f32 reference of the PyTorch module."""
    out = x.reshape(-1, in_channels).astype(jnp.float32)
    for w, b in params:
        out = jnp.maximum(out @ w.T + b, 0.0)
    return out


if __name__ == "__main__":
    # Small shapes consistent with the module's forward:
    # x of shape [2, 4, 16] -> view(-1, in_channels=16) -> [8, 16]
    in_channels = 16
    hidden_layers = [32, 64]
    out_channels = 8
    layer_dims = tuple([in_channels] + hidden_layers + [out_channels])

    key = jax.random.PRNGKey(0)
    key, kx = jax.random.split(key)
    x = jax.random.normal(kx, (2, 4, in_channels), dtype=jnp.float32)

    params = init_body_net_params(key, in_channels, hidden_layers, out_channels)
    packed = pack_body_net_params(params)      # one-time: transpose+pad+bf16

    out = body_net_forward(x, packed, layer_dims=layer_dims)
    out = jax.block_until_ready(out)

    assert out.shape == (8, out_channels)
    assert out.dtype == jnp.float32

    ref = body_net_reference(x, params, in_channels)
    max_err = float(jnp.max(jnp.abs(out - ref)))
    # bf16 matmul operands with f32 accumulation -> ~1e-2-level differences.
    assert max_err < 5e-2, f"mismatch vs f32 reference: {max_err}"

    print("KERNEL_OK")
</pallas_src>

<mosaic_0001>
module attributes {stable_mosaic.version = 11 : i64} {
  func.func @kernel(%arg0: i32, %arg1: memref<16x16xbf16, #tpu.memory_space<vmem>>, %arg2: memref<16x128xbf16, #tpu.memory_space<vmem>>, %arg3: memref<1x128xf32, #tpu.memory_space<vmem>>, %arg4: memref<128x128xbf16, #tpu.memory_space<vmem>>, %arg5: memref<1x128xf32, #tpu.memory_space<vmem>>, %arg6: memref<128x128xbf16, #tpu.memory_space<vmem>>, %arg7: memref<1x128xf32, #tpu.memory_space<vmem>>, %arg8: memref<16x128xf32, #tpu.memory_space<vmem>>) attributes {dimension_semantics = [#tpu.dimension_semantics<parallel>], iteration_bounds = array<i64: 1>, scalar_prefetch = 0 : i64, scratch_operands = 0 : i64, tpu.core_type = #tpu.core_type<tc>, window_params = [{transform_indices = @transform_0, window_bounds = array<i64: 16, 16>}, {pipeline_mode = #tpu.pipeline_mode<synchronous>, transform_indices = @transform_1, window_bounds = array<i64: 16, 128>}, {pipeline_mode = #tpu.pipeline_mode<synchronous>, transform_indices = @transform_2, window_bounds = array<i64: 1, 128>}, {pipeline_mode = #tpu.pipeline_mode<synchronous>, transform_indices = @transform_3, window_bounds = array<i64: 128, 128>}, {pipeline_mode = #tpu.pipeline_mode<synchronous>, transform_indices = @transform_4, window_bounds = array<i64: 1, 128>}, {pipeline_mode = #tpu.pipeline_mode<synchronous>, transform_indices = @transform_5, window_bounds = array<i64: 128, 128>}, {pipeline_mode = #tpu.pipeline_mode<synchronous>, transform_indices = @transform_6, window_bounds = array<i64: 1, 128>}, {transform_indices = @transform_7, window_bounds = array<i64: 16, 128>}]} {
    %c0 = arith.constant 0 : index
    %c0_0 = arith.constant 0 : index
    %0 = vector.load %arg1[%c0, %c0_0] : memref<16x16xbf16, #tpu.memory_space<vmem>>, vector<16x16xbf16>
    %c0_1 = arith.constant 0 : index
    %c0_2 = arith.constant 0 : index
    %1 = vector.load %arg2[%c0_1, %c0_2] : memref<16x128xbf16, #tpu.memory_space<vmem>>, vector<16x128xbf16>
    %c0_3 = arith.constant 0 : index
    %c0_4 = arith.constant 0 : index
    %2 = vector.load %arg3[%c0_3, %c0_4] : memref<1x128xf32, #tpu.memory_space<vmem>>, vector<1x128xf32>
    %cst = arith.constant dense<0.000000e+00> : vector<16x128xf32>
    %3 = tpu.matmul %0, %1, %cst {dimension_numbers = #tpu.dot_dimension_numbers<[1], [0], [0], [1], [0, 0, 1, 1], [], []>} : vector<16x16xbf16>, vector<16x128xbf16>, vector<16x128xf32> -> vector<16x128xf32>
    %4 = vector.broadcast %2 : vector<1x128xf32> to vector<16x128xf32>
    %5 = arith.addf %3, %4 : vector<16x128xf32>
    %cst_5 = arith.constant 0.000000e+00 : f32
    %6 = vector.broadcast %cst_5 : f32 to vector<16x128xf32>
    %7 = arith.maximumf %5, %6 : vector<16x128xf32>
    %c0_6 = arith.constant 0 : index
    %c0_7 = arith.constant 0 : index
    %8 = vector.load %arg4[%c0_6, %c0_7] : memref<128x128xbf16, #tpu.memory_space<vmem>>, vector<128x128xbf16>
    %c0_8 = arith.constant 0 : index
    %c0_9 = arith.constant 0 : index
    %9 = vector.load %arg5[%c0_8, %c0_9] : memref<1x128xf32, #tpu.memory_space<vmem>>, vector<1x128xf32>
    %10 = arith.truncf %7 : vector<16x128xf32> to vector<16x128xbf16>
    %cst_10 = arith.constant dense<0.000000e+00> : vector<16x128xf32>
    %11 = tpu.matmul %10, %8, %cst_10 {dimension_numbers = #tpu.dot_dimension_numbers<[1], [0], [0], [1], [0, 0, 1, 1], [], []>} : vector<16x128xbf16>, vector<128x128xbf16>, vector<16x128xf32> -> vector<16x128xf32>
    %12 = vector.broadcast %9 : vector<1x128xf32> to vector<16x128xf32>
    %13 = arith.addf %11, %12 : vector<16x128xf32>
    %cst_11 = arith.constant 0.000000e+00 : f32
    %14 = vector.broadcast %cst_11 : f32 to vector<16x128xf32>
    %15 = arith.maximumf %13, %14 : vector<16x128xf32>
    %c0_12 = arith.constant 0 : index
    %c0_13 = arith.constant 0 : index
    %16 = vector.load %arg6[%c0_12, %c0_13] : memref<128x128xbf16, #tpu.memory_space<vmem>>, vector<128x128xbf16>
    %c0_14 = arith.constant 0 : index
    %c0_15 = arith.constant 0 : index
    %17 = vector.load %arg7[%c0_14, %c0_15] : memref<1x128xf32, #tpu.memory_space<vmem>>, vector<1x128xf32>
    %18 = arith.truncf %15 : vector<16x128xf32> to vector<16x128xbf16>
    %cst_16 = arith.constant dense<0.000000e+00> : vector<16x128xf32>
    %19 = tpu.matmul %18, %16, %cst_16 {dimension_numbers = #tpu.dot_dimension_numbers<[1], [0], [0], [1], [0, 0, 1, 1], [], []>} : vector<16x128xbf16>, vector<128x128xbf16>, vector<16x128xf32> -> vector<16x128xf32>
    %20 = vector.broadcast %17 : vector<1x128xf32> to vector<16x128xf32>
    %21 = arith.addf %19, %20 : vector<16x128xf32>
    %cst_17 = arith.constant 0.000000e+00 : f32
    %22 = vector.broadcast %cst_17 : f32 to vector<16x128xf32>
    %23 = arith.maximumf %21, %22 : vector<16x128xf32>
    %c0_18 = arith.constant 0 : index
    %c0_19 = arith.constant 0 : index
    %24 = vector.load %arg8[%c0_18, %c0_19] : memref<16x128xf32, #tpu.memory_space<vmem>>, vector<16x128xf32>
    tpu.vector_store %arg8[%c0_18, %c0_19], %23 {strides = array<i32>} : memref<16x128xf32, #tpu.memory_space<vmem>>, vector<16x128xf32>,
    return
  }
  func.func @transform_0(%arg0: i32) -> (i32, i32) {
    %c0_i32 = arith.constant 0 : i32
    %c0_i32_0 = arith.constant 0 : i32
    return %arg0, %c0_i32 : i32, i32
  }
  func.func @transform_1(%arg0: i32) -> (i32, i32) {
    %c0_i32 = arith.constant 0 : i32
    %c0_i32_0 = arith.constant 0 : i32
    %c0_i32_1 = arith.constant 0 : i32
    return %c0_i32, %c0_i32_0 : i32, i32
  }
  func.func @transform_2(%arg0: i32) -> (i32, i32) {
    %c0_i32 = arith.constant 0 : i32
    %c0_i32_0 = arith.constant 0 : i32
    %c0_i32_1 = arith.constant 0 : i32
    return %c0_i32, %c0_i32_0 : i32, i32
  }
  func.func @transform_3(%arg0: i32) -> (i32, i32) {
    %c0_i32 = arith.constant 0 : i32
    %c0_i32_0 = arith.constant 0 : i32
    %c0_i32_1 = arith.constant 0 : i32
    return %c0_i32, %c0_i32_0 : i32, i32
  }
  func.func @transform_4(%arg0: i32) -> (i32, i32) {
    %c0_i32 = arith.constant 0 : i32
    %c0_i32_0 = arith.constant 0 : i32
    %c0_i32_1 = arith.constant 0 : i32
    return %c0_i32, %c0_i32_0 : i32, i32
  }
  func.func @transform_5(%arg0: i32) -> (i32, i32) {
    %c0_i32 = arith.constant 0 : i32
    %c0_i32_0 = arith.constant 0 : i32
    %c0_i32_1 = arith.constant 0 : i32
    return %c0_i32, %c0_i32_0 : i32, i32
  }
  func.func @transform_6(%arg0: i32) -> (i32, i32) {
    %c0_i32 = arith.constant 0 : i32
    %c0_i32_0 = arith.constant 0 : i32
    %c0_i32_1 = arith.constant 0 : i32
    return %c0_i32, %c0_i32_0 : i32, i32
  }
  func.func @transform_7(%arg0: i32) -> (i32, i32) {
    %c0_i32 = arith.constant 0 : i32
    %c0_i32_0 = arith.constant 0 : i32
    return %arg0, %c0_i32 : i32, i32
  }
}

</mosaic_0001>

<bundles_post_ra>
// kernel: body_net_forward.1
= control target key start
LH: loop header
LB: loop body
LE: loop exit
PB: predicated region body
PF: predicated region fallthrough
CT: control target
= control target key end

     0   :  { %12 = vsyncpa [#allocation3], 0  ;;  %s633_s0 = inlined_call_operand.vmem [shape: bf16[16,16], index: 0, kind: input, shape index: {}]   ;;  %s634_s1 = inlined_call_operand.vmem [shape: bf16[16,128], index: 1, kind: input, shape index: {}]   ;;  %s635_s2 = inlined_call_operand.vmem [shape: f32[1,128], index: 2, kind: input, shape index: {}]   ;;  %s636_s3 = inlined_call_operand.hbm [shape: bf16[128,128], index: 3, kind: input, shape index: {}]   ;;  %s637_s4 = inlined_call_operand.vmem [shape: f32[1,128], index: 4, kind: input, shape index: {}]   ;;  %s638_s5 = inlined_call_operand.hbm [shape: bf16[128,128], index: 5, kind: input, shape index: {}]   ;;  %s639_s6 = inlined_call_operand.vmem [shape: f32[1,128], index: 6, kind: input, shape index: {}]   ;;  %s640_s7 = inlined_call_operand.vmem [shape: f32[16,128], index: 7, kind: output, shape index: {}]  }
   0x1   :  { %13 = vsyncpa [#allocation5], 0  ;;  %s522_s24 = smov [#allocation2]   ;;  %s474_s28 = scalar_lea.hbm %s636_s3, 1024 }
   0x2   :  { %s25_s25 = sshll.u32 %s522_s24, 4  ;;  %p475_p0 = scmp.ne.s32.totalorder %s636_s3, %s474_s28  ;;  %s26_s25 = int_to_ptr.vmem [resolvable:$true] %s25_s25 }
   0x3   :  { %p478_p1 = scmp.lt.u32.totalorder %s474_s28, %s636_s3 }
   0x5   :  { %p480_p2 = pnand %p478_p1, %p475_p0 }
   0x7   :  { %483 = shalt.err (!%p480_p2)
}
   0x8   :  { %s484_s10 = scalar_lea.vmem %s26_s25, 1024  ;;  %p489_p4 = scmp.lt.s32.totalorder %s26_s25, %s26_s25 }
   0x9   :  { %p485_p3 = scmp.ne.s32.totalorder %s26_s25, %s484_s10  ;;  %p490_p5 = scmp.lt.s32.totalorder %s484_s10, %s484_s10 }
   0xb   :  { %p491_p6 = por %p490_p5, %p489_p4 }
   0xd   :  { %p492_p7 = pnand %p491_p6, %p485_p3 }
   0xf   :  { %495 = shalt.err (!%p492_p7)
}
  0x10   :  { %s523_s11 = smov 64   ;;  %s524_s12 = smov 4  }
  0x11   :  { %31 = dma.hbm_to_vmem [thread:$0]  %s636_s3, 1024, %s26_s25, [#allocation3], %s523_s11, %s523_s11, %s524_s12  }
  0x12   :  { %s525_s15 = smov [#allocation4]   ;;  %s496_s19 = scalar_lea.hbm %s638_s5, 1024 }
  0x13   :  { %s39_s16 = sshll.u32 %s525_s15, 4  ;;  %p497_p8 = scmp.ne.s32.totalorder %s638_s5, %s496_s19  ;;  %s40_s16 = int_to_ptr.vmem [resolvable:$true] %s39_s16 }
  0x14   :  { %p500_p9 = scmp.lt.u32.totalorder %s496_s19, %s638_s5 }
  0x16   :  { %p502_p10 = pnand %p500_p9, %p497_p8 }
  0x18   :  { %505 = shalt.err (!%p502_p10)
}
  0x19   :  { %s506_s24 = scalar_lea.vmem %s40_s16, 1024  ;;  %p511_p12 = scmp.lt.s32.totalorder %s40_s16, %s40_s16 }
  0x1a   :  { %p507_p11 = scmp.ne.s32.totalorder %s40_s16, %s506_s24  ;;  %p512_p13 = scmp.lt.s32.totalorder %s506_s24, %s506_s24 }
  0x1c   :  { %p513_p0 = por %p512_p13, %p511_p12 }
  0x1e   :  { %p514_p1 = pnand %p513_p0, %p507_p11 }
  0x20   :  { %517 = shalt.err (!%p514_p1)
}
  0x21   :  { %45 = dma.hbm_to_vmem [thread:$0]  %s638_s5, 1024, %s40_s16, [#allocation5], %s523_s11, %s523_s11, %s524_s12  }
  0x22   :  { %518 = dma.done.wait [#allocation3], 1024  }
  0x23   :  { %519 = vsyncadd [#allocation3], 4294966272 }
  0x24   :  { %520 = dma.done.wait [#allocation5], 1024  }
  0x25   :  { %521 = vsyncadd [#allocation5], 4294966272  ;;  %v526_v0 = vmov 0.0   ;;  %vm527_vm0 = vmmov 0   ;;  %v456_v1 = vld [vmem:[%s634_s1] sm:$0xff]   ;;  %vm77_vm1 = vcmask 130048  }
  0x26   :  { %404 = vmatprep.subr.bf16.mxu0 %v526_v0  ;;  %406 = vmatprep.mubr.msk.bf16.mxu0 %vm527_vm0, %v526_v0  ;;  %v457_v2 = vld [vmem:[%s633_s0] sm:$0xff]   ;;  %v459_v4 = vld [vmem:[#allocation2 + $0x8] sm:$0xff]   ;;  %v460_v5 = vld [vmem:[#allocation2 + $0x10] sm:$0xff]  }
  0x27   :  { %410 = vmatprep.subr.bf16.mxu1 %v526_v0  ;;  %426 = vmatprep.mubr.msk.bf16.mxu1 %vm527_vm0, %v526_v0  ;;  %v458_v3 = vld [vmem:[#allocation2] sm:$0xff]   ;;  %v461_v6 = vld [vmem:[#allocation2 + $0x18] sm:$0xff]   ;;  %v463_v8 = vld [vmem:[#allocation2 + $0x28] sm:$0xff]  }
  0x28   :  { %405 = vmatpush3.bf16.msra.mxu0 %v456_v1  ;;  %411 = vmatpush3.bf16.msra.mxu1 %v458_v3  ;;  %v462_v7 = vld [vmem:[#allocation2 + $0x20] sm:$0xff]   ;;  %v464_v9 = vld [vmem:[#allocation2 + $0x30] sm:$0xff]   ;;  %v465_v10 = vld [vmem:[#allocation2 + $0x38] sm:$0xff]  }
  0x29   :  { %430 = vmatprep.subr.bf16.mxu0 %v526_v0  ;;  %412 = vmatprep.subr.bf16.mxu1 %v526_v0  ;;  %v466_v11 = vld [vmem:[#allocation4] sm:$0xff]   ;;  %v467_v12 = vld [vmem:[#allocation4 + $0x8] sm:$0xff]   ;;  %v468_v13 = vld [vmem:[#allocation4 + $0x10] sm:$0xff]  }
  0x2a   :  { %v469_v14 = vld [vmem:[#allocation4 + $0x18] sm:$0xff]   ;;  %v470_v15 = vld [vmem:[#allocation4 + $0x20] sm:$0xff]   ;;  %v471_v16 = vld [vmem:[#allocation4 + $0x28] sm:$0xff]  }
  0x2b   :  { %407 = vmatmul.mubr.msk.bf16.vlgmr.msra.gmra.mrb[0].mxu0 %vm77_vm1, %v457_v2  ;;  %v362_v17 = vld [vmem:[%s635_s2] ss:$0 sm:$0xff]  ;;  %v472_v27 = vld [vmem:[#allocation4 + $0x30] sm:$0xff]   ;;  %v473_v28 = vld [vmem:[#allocation4 + $0x38] sm:$0xff]  }
  0x2c   :  { %446 = vmatprep.mubr.msk.bf16.mxu0 %vm527_vm0, %v526_v0  ;;  %413 = vmatpush3.bf16.msra.mxu1 %v459_v4  ;;  %v366_v29 = vld [vmem:[%s637_s4] ss:$0 sm:$0xff] }
  0x2d   :  { %414 = vmatprep.subr.bf16.mxu1 %v526_v0  ;;  %431 = vmatpush3.bf16.msra.mxu0 %v466_v11  ;;  %v375_v39 = vld [vmem:[%s639_s6] ss:$0 sm:$0xff] }
  0x2e   :  { %432 = vmatprep.subr.bf16.mxu0 %v526_v0 }
  0x30   :  { %415 = vmatpush3.bf16.msra.mxu1 %v460_v5 }
  0x31   :  { %416 = vmatprep.subr.bf16.mxu1 %v526_v0  ;;  %433 = vmatpush3.bf16.msra.mxu0 %v467_v12 }
  0x32   :  { %434 = vmatprep.subr.bf16.mxu0 %v526_v0 }
  0x34   :  { %417 = vmatpush3.bf16.msra.mxu1 %v461_v6 }
  0x35   :  { %418 = vmatprep.subr.bf16.mxu1 %v526_v0  ;;  %435 = vmatpush3.bf16.msra.mxu0 %v468_v13 }
  0x36   :  { %436 = vmatprep.subr.bf16.mxu0 %v526_v0 }
  0x38   :  { %419 = vmatpush3.bf16.msra.mxu1 %v462_v7 }
  0x39   :  { %420 = vmatprep.subr.bf16.mxu1 %v526_v0  ;;  %437 = vmatpush3.bf16.msra.mxu0 %v469_v14 }
  0x3a   :  { %438 = vmatprep.subr.bf16.mxu0 %v526_v0 }
  0x3c   :  { %421 = vmatpush3.bf16.msra.mxu1 %v463_v8 }
  0x3d   :  { %422 = vmatprep.subr.bf16.mxu1 %v526_v0  ;;  %439 = vmatpush3.bf16.msra.mxu0 %v470_v15 }
  0x3e   :  { %440 = vmatprep.subr.bf16.mxu0 %v526_v0 }
  0x40   :  { %423 = vmatpush3.bf16.msra.mxu1 %v464_v9 }
  0x41   :  { %424 = vmatprep.subr.bf16.mxu1 %v526_v0  ;;  %441 = vmatpush3.bf16.msra.mxu0 %v471_v16 }
  0x42   :  { %442 = vmatprep.subr.bf16.mxu0 %v526_v0 }
  0x44   :  { %425 = vmatpush3.bf16.msra.mxu1 %v465_v10 }
  0x45   :  { %443 = vmatpush3.bf16.msra.mxu0 %v472_v27 }
  0x46   :  { %444 = vmatprep.subr.bf16.mxu0 %v526_v0 }
  0x49   :  { %445 = vmatpush3.bf16.msra.mxu0 %v473_v28 }
  0xfe   :  { %v115_v18 = vpop.f32.mrb[0].mxu0 }
  0xff   :  { %v116_v19 = vadd.f32 %v362_v17, %v115_v18  ;;  %v408_v20 = vpop.f32.mrb[1].mxu0 }
 0x100   :  { %v118_v21 = vpop.f32.mrb[2].mxu0 }
 0x101   :  { %v119_v22 = vadd.f32 %v362_v17, %v118_v21  ;;  %v409_v23 = vpop.f32.mrb[3].mxu0  ;;  %v122_v24 = vmax.f32 %v116_v19, 0.0 }
 0x103   :  { %v123_v25 = vmax.f32 %v119_v22, 0.0 }
 0x105   :  { %v141_v26 = vpack.c.bf16 %v123_v25, %v122_v24 }
 0x107   :  { %427 = vmatmul.mubr.bf16.vlgmr.msra.gmra.mrb[0].mxu1 %v141_v26 }
 0x1da   :  { %v230_v30 = vpop.f32.mrb[0].mxu1 }
 0x1db   :  { %v231_v31 = vadd.f32 %v366_v29, %v230_v30  ;;  %v428_v32 = vpop.f32.mrb[1].mxu1 }
 0x1dc   :  { %v233_v33 = vpop.f32.mrb[2].mxu1 }
 0x1dd   :  { %v234_v34 = vadd.f32 %v366_v29, %v233_v33  ;;  %v429_v35 = vpop.f32.mrb[3].mxu1  ;;  %v237_v36 = vmax.f32 %v231_v31, 0.0 }
 0x1df   :  { %v238_v37 = vmax.f32 %v234_v34, 0.0 }
 0x1e1   :  { %v256_v38 = vpack.c.bf16 %v238_v37, %v237_v36 }
 0x1e3   :  { %447 = vmatmul.mubr.bf16.vlgmr.msra.gmra.mrb[4].mxu0 %v256_v38 }
 0x2b6   :  { %v345_v40 = vpop.f32.mrb[4].mxu0 }
 0x2b7   :  { %v346_v41 = vadd.f32 %v375_v39, %v345_v40  ;;  %v448_v42 = vpop.f32.mrb[5].mxu0 }
 0x2b8   :  { %v348_v43 = vpop.f32.mrb[6].mxu0 }
 0x2b9   :  { %v352_v44 = vmax.f32 %v346_v41, 0.0  ;;  %v349_v45 = vadd.f32 %v375_v39, %v348_v43  ;;  %v449_v46 = vpop.f32.mrb[7].mxu0 }
 0x2bb   :  { %354 = vst [vmem:[%s640_s7] sm:$0xff] %v352_v44  ;;  %v353_v47 = vmax.f32 %v349_v45, 0.0 }
 0x2bd   :  { %355 = vst [vmem:[%s640_s7 + $0x8] sm:$0xff] %v353_v47 }
 0x2be   :  { %360 = vsyncpa [#allocation3], 1 }
 0x2bf   :  { %361 = vsyncpa [#allocation5], 1 }

</bundles_post_ra>
